<compile_context>
chip_gen: v5e
topology: v5e:2x2
jax: 0.10.0
libtpu: 0.0.40
codegen_flags: <defaults>
</compile_context>

<pallas_src>
import functools

import jax
import jax.numpy as jnp
import numpy as np
from jax.experimental import pallas as pl
from jax.experimental.pallas import tpu as pltpu

_BN_EPS = 1e-5


# ----------------------------------------------------------------------------
# Fused Pallas kernel
# ----------------------------------------------------------------------------
def _fused_dwdws_kernel(x_ref, w1_ref, b1_ref, a_ref, bp_ref, w2_ref, b2_ref,
                        o_ref, *, KH, KW, TR, Wo, C, stride):
    """One (batch, row-tile) step of the whole SearchableBlockDwDws block.

    Lane-dense layouts (channels fused into the minor axis):
      x_ref : (S2, Hpl, Wpl*C)  stride^2 decimated planes of the padded image
      w1_ref: (KH, KW, Wo*C)    DWS depthwise weights (BN scale folded, W-tiled)
      b1_ref: (1, Wo*C)         DWS depthwise BN shift (W-tiled)
      a_ref : (2C-1, Wo*C)      pointwise conv as diagonal bands
                                (gate0 * pointwise BN scale folded in, W-tiled)
      bp_ref: (1, Wo*Cout)      gate0 * pointwise BN shift (W-tiled)
      w2_ref: (KH, KW, Wo*C)    DW depthwise weights (gate1 * BN scale folded)
      b2_ref: (1, Wo*C)         gate1 * DW BN shift (W-tiled)
      o_ref : (TR, Wo*Cout)     combined output row tile (lane-dense store)
    """
    WoC = Wo * C
    rt = pl.program_id(1)
    row_base = pl.multiple_of(rt * TR, TR)

    w1 = w1_ref[...].astype(jnp.float32)
    w2 = w2_ref[...].astype(jnp.float32)

    acc1 = jnp.zeros((TR, WoC), jnp.float32)
    acc2 = jnp.zeros((TR, WoC), jnp.float32)
    # KH*KW depthwise taps; every tap is a contiguous, lane-dense slice of one
    # decimated plane and feeds both branches (input tile read once per tap).
    for kh in range(KH):
        for kw in range(KW):
            plane = (kh % stride) * stride + (kw % stride)
            r0 = row_base + kh // stride
            c0 = (kw // stride) * C
            patch = x_ref[plane, pl.ds(r0, TR), pl.ds(c0, WoC)]
            patch = patch.astype(jnp.float32)
            acc1 = acc1 + patch * w1[kh, kw, :]
            acc2 = acc2 + patch * w2[kh, kw, :]

    # DW branch (thermometric gate folded into w2 / b2).  Cout == C, so the
    # flattened lane layout already matches the output layout.
    dw_out = jnp.maximum(acc2 + b2_ref[0, :], 0.0)

    # DWS branch: depthwise -> ReLU -> 1x1 conv -> ReLU (gate folded into a/bp).
    h = jnp.maximum(acc1 + b1_ref[0, :], 0.0)

    # Pointwise 1x1 conv directly in the flattened layout as 2C-1 diagonal
    # bands:  out[w*C+co] = sum_ci h[w*C+ci] * wp[ci, co]
    #                     = sum_d roll(h * band_d, d)[w*C+co]
    # Exact f32 on the VPU (plus one static lane rotate per band).  Wrapped
    # lanes are always zero because band_d masks channels that would cross a
    # pixel boundary.
    # TODO(synk): for larger C (>= ~16) move this onto the MXU instead.
    a = a_ref[...].astype(jnp.float32)
    pw = h * a[C - 1, :]
    for d in range(1, C):
        pw = pw + jnp.roll(h * a[C - 1 + d, :], d, axis=1)
        pw = pw + jnp.roll(h * a[C - 1 - d, :], -d, axis=1)
    dws_out = jnp.maximum(pw + bp_ref[0, :], 0.0)

    # Thermometric combine is just an add (gates folded upstream).
    o_ref[...] = (dws_out + dw_out).astype(o_ref.dtype)


# ----------------------------------------------------------------------------
# Host-side helpers
# ----------------------------------------------------------------------------
def _fold_bn(bn):
    scale = bn["gamma"] / jnp.sqrt(bn["var"] + _BN_EPS)
    shift = bn["beta"] - bn["mean"] * scale
    return scale, shift


def _pick_row_tile(Ho, row_bytes, max_tile_bytes=2 << 20):
    """Largest row tile: all of Ho if it fits the budget, else the biggest
    multiple-of-8 divisor (keeps the (8,128) block-shape constraint)."""
    if Ho * row_bytes <= max_tile_bytes:
        return Ho
    best = 0
    for d in range(8, Ho, 8):
        if Ho % d == 0 and d * row_bytes <= max_tile_bytes:
            best = d
    # TODO(synk): ragged Ho (no multiple-of-8 divisor under budget) falls back
    # to one whole-height tile; add masked partial row tiles if that matters.
    return best if best > 0 else Ho


def _vmem_limit_bytes():
    try:
        kind = jax.devices()[0].device_kind.lower()
    except Exception:
        kind = ""
    if "v7" in kind:
        return 48 * 1024 * 1024       # 64 MiB physical VMEM per core on v7x
    if "v5" in kind or "v6" in kind:
        return 96 * 1024 * 1024       # 128 MiB physical VMEM
    return 32 * 1024 * 1024


def _prep_input(x_nchw, *, stride, padding, KH, KW, Ho, Wo, storage_dtype):
    """NCHW -> zero-padded, stride-decimated, lane-flattened layout
    (N, stride^2, Hpl, Wpl*C).  Every depthwise tap becomes a contiguous
    (rows, Wo*C) slice of one plane: no strided or channel-minor loads in the
    kernel for any stride."""
    N, C, H, W = x_nchw.shape
    x = jnp.transpose(x_nchw, (0, 2, 3, 1))                      # NHWC
    # TODO(synk): this transpose+pad+decimate is one extra activation-sized HBM
    # pass; carrying the flattened layout through the surrounding graph (or
    # masking edge taps in-kernel) would remove it.
    x = jnp.pad(x, ((0, 0), (padding, padding), (padding, padding), (0, 0)))
    Hpl = (KH - 1) // stride + Ho
    Wpl = (KW - 1) // stride + Wo
    planes = []
    for rp in range(stride):
        for cp in range(stride):
            p = x[:, rp::stride, cp::stride, :][:, :Hpl, :Wpl, :]
            pr, pc = Hpl - p.shape[1], Wpl - p.shape[2]
            if pr > 0 or pc > 0:
                p = jnp.pad(p, ((0, 0), (0, pr), (0, pc), (0, 0)))
            planes.append(p)
    xs = jnp.stack(planes, axis=1).reshape(N, stride * stride, Hpl, Wpl * C)
    return xs.astype(storage_dtype), Hpl, Wpl


def _pointwise_bands(wp_folded, Wo):
    """Rewrite a (C, Cout) 1x1-conv weight (C == Cout) as 2C-1 diagonal-band
    lane vectors of length Wo*C: band d carries wp[ci, ci+d] at lane w*C+ci."""
    C, Cout = wp_folded.shape
    assert C == Cout
    ci = jnp.arange(C)
    bands = []
    for d in range(-(C - 1), C):
        co = ci + d
        valid = (co >= 0) & (co < C)
        vec = jnp.where(valid, wp_folded[ci, jnp.clip(co, 0, C - 1)], 0.0)
        bands.append(jnp.tile(vec, Wo))
    return jnp.stack(bands, axis=0)                               # (2C-1, Wo*C)


# ----------------------------------------------------------------------------
# Wrapper
# ----------------------------------------------------------------------------
def searchable_block_dwdws(x_nchw, params, *, stride, padding,
                           storage_dtype=jnp.float32):
    """Forward pass of SearchableBlockDwDws.  Input/output are NCHW."""
    N, C, H, W = x_nchw.shape
    KH, KW, _ = params["dws"]["dw_w"].shape
    Cout = params["dws"]["pw_w"].shape[1]
    assert C == Cout, "DW branch preserves channels: in_channels must equal out_channels"

    Hp, Wp = H + 2 * padding, W + 2 * padding
    Ho = (Hp - KH) // stride + 1
    Wo = (Wp - KW) // stride + 1
    WoC, WoCo = Wo * C, Wo * Cout
    S2 = stride * stride

    # Fold eval-mode BN and the (non-negative) thermometric softmax gates into
    # the conv weights / shifts on the host (relu(g*y) == g*relu(y) for g >= 0).
    g = jax.nn.softmax(params["theta"], axis=0)                   # (2, Cout)
    s1, b1 = _fold_bn(params["dws"]["dw_bn"])
    sp, bp = _fold_bn(params["dws"]["pw_bn"])
    s2, b2 = _fold_bn(params["dw"]["dw_bn"])

    w1 = params["dws"]["dw_w"] * s1                               # (KH, KW, C)
    wp = params["dws"]["pw_w"] * (g[0] * sp)                      # (C, Cout)
    w2 = params["dw"]["dw_w"] * (g[1] * s2)                       # (KH, KW, C)

    # Lane-dense (W-tiled) parameter layouts: no in-kernel broadcasts needed.
    w1_t = jnp.tile(w1, (1, 1, Wo)).astype(storage_dtype)         # (KH,KW,WoC)
    w2_t = jnp.tile(w2, (1, 1, Wo)).astype(storage_dtype)
    b1_t = jnp.tile(b1, Wo).reshape(1, WoC).astype(jnp.float32)
    b2_t = jnp.tile(g[1] * b2, Wo).reshape(1, WoC).astype(jnp.float32)
    bp_t = jnp.tile(g[0] * bp, Wo).reshape(1, WoCo).astype(jnp.float32)
    a_t = _pointwise_bands(wp, Wo).astype(storage_dtype)          # (2C-1, WoC)

    xs, Hpl, Wpl = _prep_input(x_nchw, stride=stride, padding=padding,
                               KH=KH, KW=KW, Ho=Ho, Wo=Wo,
                               storage_dtype=storage_dtype)

    out_dtype = storage_dtype
    TR = _pick_row_tile(Ho, WoCo * jnp.dtype(out_dtype).itemsize)
    num_rt = Ho // TR

    kernel = functools.partial(_fused_dwdws_kernel, KH=KH, KW=KW, TR=TR,
                               Wo=Wo, C=C, stride=stride)

    itemsize = jnp.dtype(storage_dtype).itemsize
    cost = pl.CostEstimate(
        flops=int(N * Ho * Wo * C * (4 * KH * KW + 2 * Cout)),
        transcendentals=0,
        bytes_accessed=int(xs.size * itemsize + N * Ho * WoCo * itemsize
                           + (w1_t.size + w2_t.size + a_t.size) * itemsize),
    )

    out = pl.pallas_call(
        kernel,
        out_shape=jax.ShapeDtypeStruct((N, Ho, WoCo), out_dtype),
        grid=(N, num_rt),
        in_specs=[
            # Full decimated/padded image per batch element; invariant along
            # the row-tile axis so it is not re-DMAed between row tiles.
            # TODO(synk): add a column tile with a (KW-1) halo for production
            # spatial sizes so the image fits v7x's 64 MiB VMEM.
            pl.BlockSpec((None, S2, Hpl, Wpl * C), lambda n, r: (n, 0, 0, 0)),
            pl.BlockSpec((KH, KW, WoC), lambda n, r: (0, 0, 0)),
            pl.BlockSpec((1, WoC), lambda n, r: (0, 0)),
            pl.BlockSpec((2 * C - 1, WoC), lambda n, r: (0, 0)),
            pl.BlockSpec((1, WoCo), lambda n, r: (0, 0)),
            pl.BlockSpec((KH, KW, WoC), lambda n, r: (0, 0, 0)),
            pl.BlockSpec((1, WoC), lambda n, r: (0, 0)),
        ],
        out_specs=pl.BlockSpec((None, TR, WoCo), lambda n, r: (n, r, 0)),
        compiler_params=pltpu.CompilerParams(
            dimension_semantics=("parallel", "parallel"),
            vmem_limit_bytes=_vmem_limit_bytes()),
        cost_estimate=cost,
    )(xs, w1_t, b1_t, a_t, bp_t, w2_t, b2_t)

    # Pure layout plumbing back to the module's NCHW contract.
    return jnp.transpose(out.reshape(N, Ho, Wo, Cout), (0, 3, 1, 2))


# ----------------------------------------------------------------------------
# Pure-JAX reference (for correctness check)
# ----------------------------------------------------------------------------
def _ref_dw_block(x_nhwc, w_khkwc, bn, *, stride, padding):
    KH, KW, C = w_khkwc.shape
    y = jax.lax.conv_general_dilated(
        x_nhwc, w_khkwc.reshape(KH, KW, 1, C),
        window_strides=(stride, stride),
        padding=[(padding, padding), (padding, padding)],
        dimension_numbers=("NHWC", "HWIO", "NHWC"),
        feature_group_count=C)
    s, b = _fold_bn(bn)
    return jnp.maximum(y * s + b, 0.0)


def ref_forward(x_nchw, params, *, stride, padding):
    x = jnp.transpose(x_nchw, (0, 2, 3, 1))
    h = _ref_dw_block(x, params["dws"]["dw_w"], params["dws"]["dw_bn"],
                      stride=stride, padding=padding)
    s, b = _fold_bn(params["dws"]["pw_bn"])
    y_dws = jnp.maximum(
        jnp.einsum("nhwc,cd->nhwd", h, params["dws"]["pw_w"]) * s + b, 0.0)
    y_dw = _ref_dw_block(x, params["dw"]["dw_w"], params["dw"]["dw_bn"],
                         stride=stride, padding=padding)
    g = jax.nn.softmax(params["theta"], axis=0)
    y = y_dws * g[0] + y_dw * g[1]
    return jnp.transpose(y, (0, 3, 1, 2))


# ----------------------------------------------------------------------------
# Main
# ----------------------------------------------------------------------------
if __name__ == "__main__":
    N, C_in, H, W = 2, 4, 16, 16
    C_out = 4            # DW branch preserves channels -> in == out required
    KH = KW = 3

    key = jax.random.PRNGKey(0)
    ks = iter(jax.random.split(key, 24))

    def kaiming(kk, shape, fan_in):
        return (jax.random.normal(kk, shape, jnp.float32)
                * jnp.sqrt(2.0 / fan_in)).astype(jnp.float32)

    def bn_params(C):
        return dict(
            gamma=1.0 + 0.1 * jax.random.normal(next(ks), (C,), jnp.float32),
            beta=0.1 * jax.random.normal(next(ks), (C,), jnp.float32),
            mean=0.1 * jax.random.normal(next(ks), (C,), jnp.float32),
            var=jnp.abs(jax.random.normal(next(ks), (C,), jnp.float32)) + 0.5,
        )

    params = {
        "dws": {
            "dw_w": kaiming(next(ks), (KH, KW, C_in), KH * KW),   # groups=C_in
            "dw_bn": bn_params(C_in),
            "pw_w": kaiming(next(ks), (C_in, C_out), C_in),       # 1x1 conv
            "pw_bn": bn_params(C_out),
        },
        "dw": {
            "dw_w": kaiming(next(ks), (KH, KW, C_in), KH * KW),
            "dw_bn": bn_params(C_in),
        },
        "theta": 0.5 * jax.random.normal(next(ks), (2, C_out), jnp.float32),
    }

    x = jax.random.normal(next(ks), (N, C_in, H, W), jnp.float32)

    # stride=1 and stride=2 (both with padding=1) against the pure-JAX reference.
    for stride in (1, 2):
        out = jax.block_until_ready(
            searchable_block_dwdws(x, params, stride=stride, padding=1))
        ref = ref_forward(x, params, stride=stride, padding=1)
        np.testing.assert_allclose(np.asarray(out), np.asarray(ref),
                                   rtol=1e-4, atol=1e-4)

    print("KERNEL_OK")
</pallas_src>

<mosaic_0001>
module attributes {stable_mosaic.version = 11 : i64} {
  func.func @_fused_dwdws_kernel(%arg0: i32, %arg1: i32, %arg2: memref<1x1x18x72xf32, #tpu.memory_space<vmem>>, %arg3: memref<3x3x64xf32, #tpu.memory_space<vmem>>, %arg4: memref<1x64xf32, #tpu.memory_space<vmem>>, %arg5: memref<7x64xf32, #tpu.memory_space<vmem>>, %arg6: memref<1x64xf32, #tpu.memory_space<vmem>>, %arg7: memref<3x3x64xf32, #tpu.memory_space<vmem>>, %arg8: memref<1x64xf32, #tpu.memory_space<vmem>>, %arg9: memref<1x16x64xf32, #tpu.memory_space<vmem>>) attributes {dimension_semantics = [#tpu.dimension_semantics<parallel>, #tpu.dimension_semantics<parallel>], iteration_bounds = array<i64: 2, 1>, scalar_prefetch = 0 : i64, scratch_operands = 0 : i64, tpu.core_type = #tpu.core_type<tc>, window_params = [{transform_indices = @transform_0, window_bounds = array<i64: 1, 1, 18, 72>}, {pipeline_mode = #tpu.pipeline_mode<synchronous>, transform_indices = @transform_1, window_bounds = array<i64: 3, 3, 64>}, {pipeline_mode = #tpu.pipeline_mode<synchronous>, transform_indices = @transform_2, window_bounds = array<i64: 1, 64>}, {pipeline_mode = #tpu.pipeline_mode<synchronous>, transform_indices = @transform_3, window_bounds = array<i64: 7, 64>}, {pipeline_mode = #tpu.pipeline_mode<synchronous>, transform_indices = @transform_4, window_bounds = array<i64: 1, 64>}, {pipeline_mode = #tpu.pipeline_mode<synchronous>, transform_indices = @transform_5, window_bounds = array<i64: 3, 3, 64>}, {pipeline_mode = #tpu.pipeline_mode<synchronous>, transform_indices = @transform_6, window_bounds = array<i64: 1, 64>}, {transform_indices = @transform_7, window_bounds = array<i64: 1, 16, 64>}]} {
    %c16_i32 = arith.constant 16 : i32
    %0 = arith.muli %arg1, %c16_i32 : i32
    %1 = tpu.assume_multiple %0, 16 : i32
    %c0 = arith.constant 0 : index
    %c0_0 = arith.constant 0 : index
    %c0_1 = arith.constant 0 : index
    %2 = vector.load %arg3[%c0, %c0_0, %c0_1] : memref<3x3x64xf32, #tpu.memory_space<vmem>>, vector<3x3x64xf32>
    %c0_2 = arith.constant 0 : index
    %c0_3 = arith.constant 0 : index
    %c0_4 = arith.constant 0 : index
    %3 = vector.load %arg7[%c0_2, %c0_3, %c0_4] : memref<3x3x64xf32, #tpu.memory_space<vmem>>, vector<3x3x64xf32>
    %cst = arith.constant 0.000000e+00 : f32
    %4 = vector.broadcast %cst : f32 to vector<16x64xf32>
    %cst_5 = arith.constant 0.000000e+00 : f32
    %5 = vector.broadcast %cst_5 : f32 to vector<16x64xf32>
    %c0_i32 = arith.constant 0 : i32
    %6 = arith.addi %1, %c0_i32 : i32
    %c0_6 = arith.constant 0 : index
    %c0_7 = arith.constant 0 : index
    %7 = arith.index_cast %6 : i32 to index
    %c0_8 = arith.constant 0 : index
    %8 = vector.load %arg2[%c0_6, %c0_7, %7, %c0_8] : memref<1x1x18x72xf32, #tpu.memory_space<vmem>>, vector<1x1x16x64xf32>
    %9 = vector.shape_cast %8 : vector<1x1x16x64xf32> to vector<16x64xf32>
    %10 = vector.extract_strided_slice %2 {offsets = [0, 0, 0], sizes = [1, 1, 64], strides = [1, 1, 1]} : vector<3x3x64xf32> to vector<1x1x64xf32>
    %11 = vector.shape_cast %10 : vector<1x1x64xf32> to vector<64xf32>
    %12 = vector.shape_cast %11 : vector<64xf32> to vector<1x64xf32>
    %13 = vector.broadcast %12 : vector<1x64xf32> to vector<16x64xf32>
    %14 = arith.mulf %9, %13 : vector<16x64xf32>
    %15 = arith.addf %4, %14 : vector<16x64xf32>
    %16 = vector.extract_strided_slice %3 {offsets = [0, 0, 0], sizes = [1, 1, 64], strides = [1, 1, 1]} : vector<3x3x64xf32> to vector<1x1x64xf32>
    %17 = vector.shape_cast %16 : vector<1x1x64xf32> to vector<64xf32>
    %18 = vector.shape_cast %17 : vector<64xf32> to vector<1x64xf32>
    %19 = vector.broadcast %18 : vector<1x64xf32> to vector<16x64xf32>
    %20 = arith.mulf %9, %19 : vector<16x64xf32>
    %21 = arith.addf %5, %20 : vector<16x64xf32>
    %c0_i32_9 = arith.constant 0 : i32
    %22 = arith.addi %1, %c0_i32_9 : i32
    %c0_10 = arith.constant 0 : index
    %c0_11 = arith.constant 0 : index
    %23 = arith.index_cast %22 : i32 to index
    %c4 = arith.constant 4 : index
    %24 = vector.load %arg2[%c0_10, %c0_11, %23, %c4] : memref<1x1x18x72xf32, #tpu.memory_space<vmem>>, vector<1x1x16x64xf32>
    %25 = vector.shape_cast %24 : vector<1x1x16x64xf32> to vector<16x64xf32>
    %26 = vector.extract_strided_slice %2 {offsets = [0, 1, 0], sizes = [1, 1, 64], strides = [1, 1, 1]} : vector<3x3x64xf32> to vector<1x1x64xf32>
    %27 = vector.shape_cast %26 : vector<1x1x64xf32> to vector<64xf32>
    %28 = vector.shape_cast %27 : vector<64xf32> to vector<1x64xf32>
    %29 = vector.broadcast %28 : vector<1x64xf32> to vector<16x64xf32>
    %30 = arith.mulf %25, %29 : vector<16x64xf32>
    %31 = arith.addf %15, %30 : vector<16x64xf32>
    %32 = vector.extract_strided_slice %3 {offsets = [0, 1, 0], sizes = [1, 1, 64], strides = [1, 1, 1]} : vector<3x3x64xf32> to vector<1x1x64xf32>
    %33 = vector.shape_cast %32 : vector<1x1x64xf32> to vector<64xf32>
    %34 = vector.shape_cast %33 : vector<64xf32> to vector<1x64xf32>
    %35 = vector.broadcast %34 : vector<1x64xf32> to vector<16x64xf32>
    %36 = arith.mulf %25, %35 : vector<16x64xf32>
    %37 = arith.addf %21, %36 : vector<16x64xf32>
    %c0_i32_12 = arith.constant 0 : i32
    %38 = arith.addi %1, %c0_i32_12 : i32
    %c0_13 = arith.constant 0 : index
    %c0_14 = arith.constant 0 : index
    %39 = arith.index_cast %38 : i32 to index
    %c8 = arith.constant 8 : index
    %40 = vector.load %arg2[%c0_13, %c0_14, %39, %c8] : memref<1x1x18x72xf32, #tpu.memory_space<vmem>>, vector<1x1x16x64xf32>
    %41 = vector.shape_cast %40 : vector<1x1x16x64xf32> to vector<16x64xf32>
    %42 = vector.extract_strided_slice %2 {offsets = [0, 2, 0], sizes = [1, 1, 64], strides = [1, 1, 1]} : vector<3x3x64xf32> to vector<1x1x64xf32>
    %43 = vector.shape_cast %42 : vector<1x1x64xf32> to vector<64xf32>
    %44 = vector.shape_cast %43 : vector<64xf32> to vector<1x64xf32>
    %45 = vector.broadcast %44 : vector<1x64xf32> to vector<16x64xf32>
    %46 = arith.mulf %41, %45 : vector<16x64xf32>
    %47 = arith.addf %31, %46 : vector<16x64xf32>
    %48 = vector.extract_strided_slice %3 {offsets = [0, 2, 0], sizes = [1, 1, 64], strides = [1, 1, 1]} : vector<3x3x64xf32> to vector<1x1x64xf32>
    %49 = vector.shape_cast %48 : vector<1x1x64xf32> to vector<64xf32>
    %50 = vector.shape_cast %49 : vector<64xf32> to vector<1x64xf32>
    %51 = vector.broadcast %50 : vector<1x64xf32> to vector<16x64xf32>
    %52 = arith.mulf %41, %51 : vector<16x64xf32>
    %53 = arith.addf %37, %52 : vector<16x64xf32>
    %c1_i32 = arith.constant 1 : i32
    %54 = arith.addi %1, %c1_i32 : i32
    %c0_15 = arith.constant 0 : index
    %c0_16 = arith.constant 0 : index
    %55 = arith.index_cast %54 : i32 to index
    %c0_17 = arith.constant 0 : index
    %56 = vector.load %arg2[%c0_15, %c0_16, %55, %c0_17] : memref<1x1x18x72xf32, #tpu.memory_space<vmem>>, vector<1x1x16x64xf32>
    %57 = vector.shape_cast %56 : vector<1x1x16x64xf32> to vector<16x64xf32>
    %58 = vector.extract_strided_slice %2 {offsets = [1, 0, 0], sizes = [1, 1, 64], strides = [1, 1, 1]} : vector<3x3x64xf32> to vector<1x1x64xf32>
    %59 = vector.shape_cast %58 : vector<1x1x64xf32> to vector<64xf32>
    %60 = vector.shape_cast %59 : vector<64xf32> to vector<1x64xf32>
    %61 = vector.broadcast %60 : vector<1x64xf32> to vector<16x64xf32>
    %62 = arith.mulf %57, %61 : vector<16x64xf32>
    %63 = arith.addf %47, %62 : vector<16x64xf32>
    %64 = vector.extract_strided_slice %3 {offsets = [1, 0, 0], sizes = [1, 1, 64], strides = [1, 1, 1]} : vector<3x3x64xf32> to vector<1x1x64xf32>
    %65 = vector.shape_cast %64 : vector<1x1x64xf32> to vector<64xf32>
    %66 = vector.shape_cast %65 : vector<64xf32> to vector<1x64xf32>
    %67 = vector.broadcast %66 : vector<1x64xf32> to vector<16x64xf32>
    %68 = arith.mulf %57, %67 : vector<16x64xf32>
    %69 = arith.addf %53, %68 : vector<16x64xf32>
    %c1_i32_18 = arith.constant 1 : i32
    %70 = arith.addi %1, %c1_i32_18 : i32
    %c0_19 = arith.constant 0 : index
    %c0_20 = arith.constant 0 : index
    %71 = arith.index_cast %70 : i32 to index
    %c4_21 = arith.constant 4 : index
    %72 = vector.load %arg2[%c0_19, %c0_20, %71, %c4_21] : memref<1x1x18x72xf32, #tpu.memory_space<vmem>>, vector<1x1x16x64xf32>
    %73 = vector.shape_cast %72 : vector<1x1x16x64xf32> to vector<16x64xf32>
    %74 = vector.extract_strided_slice %2 {offsets = [1, 1, 0], sizes = [1, 1, 64], strides = [1, 1, 1]} : vector<3x3x64xf32> to vector<1x1x64xf32>
    %75 = vector.shape_cast %74 : vector<1x1x64xf32> to vector<64xf32>
    %76 = vector.shape_cast %75 : vector<64xf32> to vector<1x64xf32>
    %77 = vector.broadcast %76 : vector<1x64xf32> to vector<16x64xf32>
    %78 = arith.mulf %73, %77 : vector<16x64xf32>
    %79 = arith.addf %63, %78 : vector<16x64xf32>
    %80 = vector.extract_strided_slice %3 {offsets = [1, 1, 0], sizes = [1, 1, 64], strides = [1, 1, 1]} : vector<3x3x64xf32> to vector<1x1x64xf32>
    %81 = vector.shape_cast %80 : vector<1x1x64xf32> to vector<64xf32>
    %82 = vector.shape_cast %81 : vector<64xf32> to vector<1x64xf32>
    %83 = vector.broadcast %82 : vector<1x64xf32> to vector<16x64xf32>
    %84 = arith.mulf %73, %83 : vector<16x64xf32>
    %85 = arith.addf %69, %84 : vector<16x64xf32>
    %c1_i32_22 = arith.constant 1 : i32
    %86 = arith.addi %1, %c1_i32_22 : i32
    %c0_23 = arith.constant 0 : index
    %c0_24 = arith.constant 0 : index
    %87 = arith.index_cast %86 : i32 to index
    %c8_25 = arith.constant 8 : index
    %88 = vector.load %arg2[%c0_23, %c0_24, %87, %c8_25] : memref<1x1x18x72xf32, #tpu.memory_space<vmem>>, vector<1x1x16x64xf32>
    %89 = vector.shape_cast %88 : vector<1x1x16x64xf32> to vector<16x64xf32>
    %90 = vector.extract_strided_slice %2 {offsets = [1, 2, 0], sizes = [1, 1, 64], strides = [1, 1, 1]} : vector<3x3x64xf32> to vector<1x1x64xf32>
    %91 = vector.shape_cast %90 : vector<1x1x64xf32> to vector<64xf32>
    %92 = vector.shape_cast %91 : vector<64xf32> to vector<1x64xf32>
    %93 = vector.broadcast %92 : vector<1x64xf32> to vector<16x64xf32>
    %94 = arith.mulf %89, %93 : vector<16x64xf32>
    %95 = arith.addf %79, %94 : vector<16x64xf32>
    %96 = vector.extract_strided_slice %3 {offsets = [1, 2, 0], sizes = [1, 1, 64], strides = [1, 1, 1]} : vector<3x3x64xf32> to vector<1x1x64xf32>
    %97 = vector.shape_cast %96 : vector<1x1x64xf32> to vector<64xf32>
    %98 = vector.shape_cast %97 : vector<64xf32> to vector<1x64xf32>
    %99 = vector.broadcast %98 : vector<1x64xf32> to vector<16x64xf32>
    %100 = arith.mulf %89, %99 : vector<16x64xf32>
    %101 = arith.addf %85, %100 : vector<16x64xf32>
    %c2_i32 = arith.constant 2 : i32
    %102 = arith.addi %1, %c2_i32 : i32
    %c0_26 = arith.constant 0 : index
    %c0_27 = arith.constant 0 : index
    %103 = arith.index_cast %102 : i32 to index
    %c0_28 = arith.constant 0 : index
    %104 = vector.load %arg2[%c0_26, %c0_27, %103, %c0_28] : memref<1x1x18x72xf32, #tpu.memory_space<vmem>>, vector<1x1x16x64xf32>
    %105 = vector.shape_cast %104 : vector<1x1x16x64xf32> to vector<16x64xf32>
    %106 = vector.extract_strided_slice %2 {offsets = [2, 0, 0], sizes = [1, 1, 64], strides = [1, 1, 1]} : vector<3x3x64xf32> to vector<1x1x64xf32>
    %107 = vector.shape_cast %106 : vector<1x1x64xf32> to vector<64xf32>
    %108 = vector.shape_cast %107 : vector<64xf32> to vector<1x64xf32>
    %109 = vector.broadcast %108 : vector<1x64xf32> to vector<16x64xf32>
    %110 = arith.mulf %105, %109 : vector<16x64xf32>
    %111 = arith.addf %95, %110 : vector<16x64xf32>
    %112 = vector.extract_strided_slice %3 {offsets = [2, 0, 0], sizes = [1, 1, 64], strides = [1, 1, 1]} : vector<3x3x64xf32> to vector<1x1x64xf32>
    %113 = vector.shape_cast %112 : vector<1x1x64xf32> to vector<64xf32>
    %114 = vector.shape_cast %113 : vector<64xf32> to vector<1x64xf32>
    %115 = vector.broadcast %114 : vector<1x64xf32> to vector<16x64xf32>
    %116 = arith.mulf %105, %115 : vector<16x64xf32>
    %117 = arith.addf %101, %116 : vector<16x64xf32>
    %c2_i32_29 = arith.constant 2 : i32
    %118 = arith.addi %1, %c2_i32_29 : i32
    %c0_30 = arith.constant 0 : index
    %c0_31 = arith.constant 0 : index
    %119 = arith.index_cast %118 : i32 to index
    %c4_32 = arith.constant 4 : index
    %120 = vector.load %arg2[%c0_30, %c0_31, %119, %c4_32] : memref<1x1x18x72xf32, #tpu.memory_space<vmem>>, vector<1x1x16x64xf32>
    %121 = vector.shape_cast %120 : vector<1x1x16x64xf32> to vector<16x64xf32>
    %122 = vector.extract_strided_slice %2 {offsets = [2, 1, 0], sizes = [1, 1, 64], strides = [1, 1, 1]} : vector<3x3x64xf32> to vector<1x1x64xf32>
    %123 = vector.shape_cast %122 : vector<1x1x64xf32> to vector<64xf32>
    %124 = vector.shape_cast %123 : vector<64xf32> to vector<1x64xf32>
    %125 = vector.broadcast %124 : vector<1x64xf32> to vector<16x64xf32>
    %126 = arith.mulf %121, %125 : vector<16x64xf32>
    %127 = arith.addf %111, %126 : vector<16x64xf32>
    %128 = vector.extract_strided_slice %3 {offsets = [2, 1, 0], sizes = [1, 1, 64], strides = [1, 1, 1]} : vector<3x3x64xf32> to vector<1x1x64xf32>
    %129 = vector.shape_cast %128 : vector<1x1x64xf32> to vector<64xf32>
    %130 = vector.shape_cast %129 : vector<64xf32> to vector<1x64xf32>
    %131 = vector.broadcast %130 : vector<1x64xf32> to vector<16x64xf32>
    %132 = arith.mulf %121, %131 : vector<16x64xf32>
    %133 = arith.addf %117, %132 : vector<16x64xf32>
    %c2_i32_33 = arith.constant 2 : i32
    %134 = arith.addi %1, %c2_i32_33 : i32
    %c0_34 = arith.constant 0 : index
    %c0_35 = arith.constant 0 : index
    %135 = arith.index_cast %134 : i32 to index
    %c8_36 = arith.constant 8 : index
    %136 = vector.load %arg2[%c0_34, %c0_35, %135, %c8_36] : memref<1x1x18x72xf32, #tpu.memory_space<vmem>>, vector<1x1x16x64xf32>
    %137 = vector.shape_cast %136 : vector<1x1x16x64xf32> to vector<16x64xf32>
    %138 = vector.extract_strided_slice %2 {offsets = [2, 2, 0], sizes = [1, 1, 64], strides = [1, 1, 1]} : vector<3x3x64xf32> to vector<1x1x64xf32>
    %139 = vector.shape_cast %138 : vector<1x1x64xf32> to vector<64xf32>
    %140 = vector.shape_cast %139 : vector<64xf32> to vector<1x64xf32>
    %141 = vector.broadcast %140 : vector<1x64xf32> to vector<16x64xf32>
    %142 = arith.mulf %137, %141 : vector<16x64xf32>
    %143 = arith.addf %127, %142 : vector<16x64xf32>
    %144 = vector.extract_strided_slice %3 {offsets = [2, 2, 0], sizes = [1, 1, 64], strides = [1, 1, 1]} : vector<3x3x64xf32> to vector<1x1x64xf32>
    %145 = vector.shape_cast %144 : vector<1x1x64xf32> to vector<64xf32>
    %146 = vector.shape_cast %145 : vector<64xf32> to vector<1x64xf32>
    %147 = vector.broadcast %146 : vector<1x64xf32> to vector<16x64xf32>
    %148 = arith.mulf %137, %147 : vector<16x64xf32>
    %149 = arith.addf %133, %148 : vector<16x64xf32>
    %c0_37 = arith.constant 0 : index
    %c0_38 = arith.constant 0 : index
    %150 = vector.load %arg8[%c0_37, %c0_38] : memref<1x64xf32, #tpu.memory_space<vmem>>, vector<1x64xf32>
    %151 = vector.shape_cast %150 : vector<1x64xf32> to vector<64xf32>
    %152 = vector.shape_cast %151 : vector<64xf32> to vector<1x64xf32>
    %153 = vector.broadcast %152 : vector<1x64xf32> to vector<16x64xf32>
    %154 = arith.addf %149, %153 : vector<16x64xf32>
    %cst_39 = arith.constant 0.000000e+00 : f32
    %155 = vector.broadcast %cst_39 : f32 to vector<16x64xf32>
    %156 = arith.maximumf %154, %155 : vector<16x64xf32>
    %c0_40 = arith.constant 0 : index
    %c0_41 = arith.constant 0 : index
    %157 = vector.load %arg4[%c0_40, %c0_41] : memref<1x64xf32, #tpu.memory_space<vmem>>, vector<1x64xf32>
    %158 = vector.shape_cast %157 : vector<1x64xf32> to vector<64xf32>
    %159 = vector.shape_cast %158 : vector<64xf32> to vector<1x64xf32>
    %160 = vector.broadcast %159 : vector<1x64xf32> to vector<16x64xf32>
    %161 = arith.addf %143, %160 : vector<16x64xf32>
    %cst_42 = arith.constant 0.000000e+00 : f32
    %162 = vector.broadcast %cst_42 : f32 to vector<16x64xf32>
    %163 = arith.maximumf %161, %162 : vector<16x64xf32>
    %c0_43 = arith.constant 0 : index
    %c0_44 = arith.constant 0 : index
    %164 = vector.load %arg5[%c0_43, %c0_44] : memref<7x64xf32, #tpu.memory_space<vmem>>, vector<7x64xf32>
    %165 = vector.extract_strided_slice %164 {offsets = [3, 0], sizes = [1, 64], strides = [1, 1]} : vector<7x64xf32> to vector<1x64xf32>
    %166 = vector.shape_cast %165 : vector<1x64xf32> to vector<64xf32>
    %167 = vector.shape_cast %166 : vector<64xf32> to vector<1x64xf32>
    %168 = vector.broadcast %167 : vector<1x64xf32> to vector<16x64xf32>
    %169 = arith.mulf %163, %168 : vector<16x64xf32>
    %170 = vector.extract_strided_slice %164 {offsets = [4, 0], sizes = [1, 64], strides = [1, 1]} : vector<7x64xf32> to vector<1x64xf32>
    %171 = vector.shape_cast %170 : vector<1x64xf32> to vector<64xf32>
    %172 = vector.shape_cast %171 : vector<64xf32> to vector<1x64xf32>
    %173 = vector.broadcast %172 : vector<1x64xf32> to vector<16x64xf32>
    %174 = arith.mulf %163, %173 : vector<16x64xf32>
    %175 = vector.extract_strided_slice %174 {offsets = [0, 63], sizes = [16, 1], strides = [1, 1]} : vector<16x64xf32> to vector<16x1xf32>
    %176 = vector.extract_strided_slice %174 {offsets = [0, 0], sizes = [16, 63], strides = [1, 1]} : vector<16x64xf32> to vector<16x63xf32>
    %177 = tpu.concatenate %175, %176 in 1 : vector<16x1xf32>, vector<16x63xf32> -> vector<16x64xf32>
    %178 = arith.addf %169, %177 : vector<16x64xf32>
    %179 = vector.extract_strided_slice %164 {offsets = [2, 0], sizes = [1, 64], strides = [1, 1]} : vector<7x64xf32> to vector<1x64xf32>
    %180 = vector.shape_cast %179 : vector<1x64xf32> to vector<64xf32>
    %181 = vector.shape_cast %180 : vector<64xf32> to vector<1x64xf32>
    %182 = vector.broadcast %181 : vector<1x64xf32> to vector<16x64xf32>
    %183 = arith.mulf %163, %182 : vector<16x64xf32>
    %184 = vector.extract_strided_slice %183 {offsets = [0, 1], sizes = [16, 63], strides = [1, 1]} : vector<16x64xf32> to vector<16x63xf32>
    %185 = vector.extract_strided_slice %183 {offsets = [0, 0], sizes = [16, 1], strides = [1, 1]} : vector<16x64xf32> to vector<16x1xf32>
    %186 = tpu.concatenate %184, %185 in 1 : vector<16x63xf32>, vector<16x1xf32> -> vector<16x64xf32>
    %187 = arith.addf %178, %186 : vector<16x64xf32>
    %188 = vector.extract_strided_slice %164 {offsets = [5, 0], sizes = [1, 64], strides = [1, 1]} : vector<7x64xf32> to vector<1x64xf32>
    %189 = vector.shape_cast %188 : vector<1x64xf32> to vector<64xf32>
    %190 = vector.shape_cast %189 : vector<64xf32> to vector<1x64xf32>
    %191 = vector.broadcast %190 : vector<1x64xf32> to vector<16x64xf32>
    %192 = arith.mulf %163, %191 : vector<16x64xf32>
    %193 = vector.extract_strided_slice %192 {offsets = [0, 62], sizes = [16, 2], strides = [1, 1]} : vector<16x64xf32> to vector<16x2xf32>
    %194 = vector.extract_strided_slice %192 {offsets = [0, 0], sizes = [16, 62], strides = [1, 1]} : vector<16x64xf32> to vector<16x62xf32>
    %195 = tpu.concatenate %193, %194 in 1 : vector<16x2xf32>, vector<16x62xf32> -> vector<16x64xf32>
    %196 = arith.addf %187, %195 : vector<16x64xf32>
    %197 = vector.extract_strided_slice %164 {offsets = [1, 0], sizes = [1, 64], strides = [1, 1]} : vector<7x64xf32> to vector<1x64xf32>
    %198 = vector.shape_cast %197 : vector<1x64xf32> to vector<64xf32>
    %199 = vector.shape_cast %198 : vector<64xf32> to vector<1x64xf32>
    %200 = vector.broadcast %199 : vector<1x64xf32> to vector<16x64xf32>
    %201 = arith.mulf %163, %200 : vector<16x64xf32>
    %202 = vector.extract_strided_slice %201 {offsets = [0, 2], sizes = [16, 62], strides = [1, 1]} : vector<16x64xf32> to vector<16x62xf32>
    %203 = vector.extract_strided_slice %201 {offsets = [0, 0], sizes = [16, 2], strides = [1, 1]} : vector<16x64xf32> to vector<16x2xf32>
    %204 = tpu.concatenate %202, %203 in 1 : vector<16x62xf32>, vector<16x2xf32> -> vector<16x64xf32>
    %205 = arith.addf %196, %204 : vector<16x64xf32>
    %206 = vector.extract_strided_slice %164 {offsets = [6, 0], sizes = [1, 64], strides = [1, 1]} : vector<7x64xf32> to vector<1x64xf32>
    %207 = vector.shape_cast %206 : vector<1x64xf32> to vector<64xf32>
    %208 = vector.shape_cast %207 : vector<64xf32> to vector<1x64xf32>
    %209 = vector.broadcast %208 : vector<1x64xf32> to vector<16x64xf32>
    %210 = arith.mulf %163, %209 : vector<16x64xf32>
    %211 = vector.extract_strided_slice %210 {offsets = [0, 61], sizes = [16, 3], strides = [1, 1]} : vector<16x64xf32> to vector<16x3xf32>
    %212 = vector.extract_strided_slice %210 {offsets = [0, 0], sizes = [16, 61], strides = [1, 1]} : vector<16x64xf32> to vector<16x61xf32>
    %213 = tpu.concatenate %211, %212 in 1 : vector<16x3xf32>, vector<16x61xf32> -> vector<16x64xf32>
    %214 = arith.addf %205, %213 : vector<16x64xf32>
    %215 = vector.extract_strided_slice %164 {offsets = [0, 0], sizes = [1, 64], strides = [1, 1]} : vector<7x64xf32> to vector<1x64xf32>
    %216 = vector.shape_cast %215 : vector<1x64xf32> to vector<64xf32>
    %217 = vector.shape_cast %216 : vector<64xf32> to vector<1x64xf32>
    %218 = vector.broadcast %217 : vector<1x64xf32> to vector<16x64xf32>
    %219 = arith.mulf %163, %218 : vector<16x64xf32>
    %220 = vector.extract_strided_slice %219 {offsets = [0, 3], sizes = [16, 61], strides = [1, 1]} : vector<16x64xf32> to vector<16x61xf32>
    %221 = vector.extract_strided_slice %219 {offsets = [0, 0], sizes = [16, 3], strides = [1, 1]} : vector<16x64xf32> to vector<16x3xf32>
    %222 = tpu.concatenate %220, %221 in 1 : vector<16x61xf32>, vector<16x3xf32> -> vector<16x64xf32>
    %223 = arith.addf %214, %222 : vector<16x64xf32>
    %c0_45 = arith.constant 0 : index
    %c0_46 = arith.constant 0 : index
    %224 = vector.load %arg6[%c0_45, %c0_46] : memref<1x64xf32, #tpu.memory_space<vmem>>, vector<1x64xf32>
    %225 = vector.shape_cast %224 : vector<1x64xf32> to vector<64xf32>
    %226 = vector.shape_cast %225 : vector<64xf32> to vector<1x64xf32>
    %227 = vector.broadcast %226 : vector<1x64xf32> to vector<16x64xf32>
    %228 = arith.addf %223, %227 : vector<16x64xf32>
    %cst_47 = arith.constant 0.000000e+00 : f32
    %229 = vector.broadcast %cst_47 : f32 to vector<16x64xf32>
    %230 = arith.maximumf %228, %229 : vector<16x64xf32>
    %231 = arith.addf %230, %156 : vector<16x64xf32>
    %c0_48 = arith.constant 0 : index
    %c0_49 = arith.constant 0 : index
    %c0_50 = arith.constant 0 : index
    %232 = vector.load %arg9[%c0_48, %c0_49, %c0_50] : memref<1x16x64xf32, #tpu.memory_space<vmem>>, vector<1x16x64xf32>
    %233 = vector.shape_cast %232 : vector<1x16x64xf32> to vector<16x64xf32>
    %234 = vector.shape_cast %231 : vector<16x64xf32> to vector<1x16x64xf32>
    tpu.vector_store %arg9[%c0_48, %c0_49, %c0_50], %234 {strides = array<i32>} : memref<1x16x64xf32, #tpu.memory_space<vmem>>, vector<1x16x64xf32>,
    return
  }
  func.func @transform_0(%arg0: i32, %arg1: i32) -> (i32, i32, i32, i32) {
    %c0_i32 = arith.constant 0 : i32
    %c0_i32_0 = arith.constant 0 : i32
    %c0_i32_1 = arith.constant 0 : i32
    %c0_i32_2 = arith.constant 0 : i32
    return %arg0, %c0_i32, %c0_i32_0, %c0_i32_1 : i32, i32, i32, i32
  }
  func.func @transform_1(%arg0: i32, %arg1: i32) -> (i32, i32, i32) {
    %c0_i32 = arith.constant 0 : i32
    %c0_i32_0 = arith.constant 0 : i32
    %c0_i32_1 = arith.constant 0 : i32
    %c0_i32_2 = arith.constant 0 : i32
    return %c0_i32, %c0_i32_0, %c0_i32_1 : i32, i32, i32
  }
  func.func @transform_2(%arg0: i32, %arg1: i32) -> (i32, i32) {
    %c0_i32 = arith.constant 0 : i32
    %c0_i32_0 = arith.constant 0 : i32
    %c0_i32_1 = arith.constant 0 : i32
    return %c0_i32, %c0_i32_0 : i32, i32
  }
  func.func @transform_3(%arg0: i32, %arg1: i32) -> (i32, i32) {
    %c0_i32 = arith.constant 0 : i32
    %c0_i32_0 = arith.constant 0 : i32
    %c0_i32_1 = arith.constant 0 : i32
    return %c0_i32, %c0_i32_0 : i32, i32
  }
  func.func @transform_4(%arg0: i32, %arg1: i32) -> (i32, i32) {
    %c0_i32 = arith.constant 0 : i32
    %c0_i32_0 = arith.constant 0 : i32
    %c0_i32_1 = arith.constant 0 : i32
    return %c0_i32, %c0_i32_0 : i32, i32
  }
  func.func @transform_5(%arg0: i32, %arg1: i32) -> (i32, i32, i32) {
    %c0_i32 = arith.constant 0 : i32
    %c0_i32_0 = arith.constant 0 : i32
    %c0_i32_1 = arith.constant 0 : i32
    %c0_i32_2 = arith.constant 0 : i32
    return %c0_i32, %c0_i32_0, %c0_i32_1 : i32, i32, i32
  }
  func.func @transform_6(%arg0: i32, %arg1: i32) -> (i32, i32) {
    %c0_i32 = arith.constant 0 : i32
    %c0_i32_0 = arith.constant 0 : i32
    %c0_i32_1 = arith.constant 0 : i32
    return %c0_i32, %c0_i32_0 : i32, i32
  }
  func.func @transform_7(%arg0: i32, %arg1: i32) -> (i32, i32, i32) {
    %c0_i32 = arith.constant 0 : i32
    %c0_i32_0 = arith.constant 0 : i32
    return %arg0, %arg1, %c0_i32 : i32, i32, i32
  }
}

</mosaic_0001>

<bundles_post_ra>
// kernel: tpu_custom_call.1
= control target key start
LH: loop header
LB: loop body
LE: loop exit
PB: predicated region body
PF: predicated region fallthrough
CT: control target
= control target key end

     0   :  { %12 = vsyncpa [#allocation3], 0  ;;  %s1320_s0 = inlined_call_operand.vmem [shape: f32[2,1,18,72], index: 0, kind: input, shape index: {}]   ;;  %s1321_s1 = inlined_call_operand.vmem [shape: f32[3,3,64], index: 1, kind: input, shape index: {}]   ;;  %s1322_s2 = inlined_call_operand.vmem [shape: f32[1,64], index: 2, kind: input, shape index: {}]   ;;  %s1323_s3 = inlined_call_operand.vmem [shape: f32[7,64], index: 3, kind: input, shape index: {}]   ;;  %s1324_s4 = inlined_call_operand.vmem [shape: f32[1,64], index: 4, kind: input, shape index: {}]   ;;  %s1325_s5 = inlined_call_operand.vmem [shape: f32[3,3,64], index: 5, kind: input, shape index: {}]   ;;  %s1326_s6 = inlined_call_operand.vmem [shape: f32[1,64], index: 6, kind: input, shape index: {}]   ;;  %s1327_s7 = inlined_call_operand.hbm [shape: f32[2,16,64], index: 7, kind: output, shape index: {}]  }
   0x1   :  { %14 = vsyncpa [#allocation3 + $0x1], 0  ;;  %s1038_s24 = smov 0   ;;  %s1040_s25 = smov 0  }
   0x2   :  { %s1042_s26 = smov 0   ;;  %s1044_s27 = smov 0  }
   0x3   :  { %s1046_s28 = smov 0   ;;  %s1048_s29 = smov 0  }
   0x4 LB: > { %s808_s30 = sadd.s32 4294967295, %s979_s29   ;;  %s809_s8 = sadd.s32 4294967294, %s979_s29   ;;  %s979_s29 = sphi %s1048_s29, %s20_s29   ;;  %s975_s28 = sphi %s1046_s28, %s1334_s28   ;;  %s971_s27 = sphi %s1044_s27, %s1333_s27   ;;  %s967_s26 = sphi %s1042_s26, %s1332_s26   ;;  %s963_s25 = sphi %s1040_s25, %s1331_s25   ;;  %s959_s24 = sphi %s1038_s24, %s1330_s24  }
   0x5   : > { %s32_s9 = sadd.s32 1, %s975_s28  ;;  %s193_s10 = sadd.s32 1, %s967_s26 }
   0x6   : > { %p34_p0 = scmp.ge.s32.totalorder %s32_s9, 2  ;;  %p203_p1 = scmp.ne.s32.totalorder %s967_s26, %s963_s25 }
   0x7   : > { %p204_p2 = scmp.eq.s32.totalorder %s808_s30, 1  ;;  %p209_p3 = scmp.ne.s32.totalorder %s963_s25, %s959_s24 }
   0x8   : > { %s1336_s9 = smov (%p34_p0, %s32_s9), 0  ;;  %p210_p5 = scmp.eq.s32.totalorder %s809_s8, 1 }
   0x9   : > { %p1078_p4 = por %p204_p2, %p203_p1  ;;  %s188_s12 = ssub.s32 %s975_s28, %s1336_s9 }
   0xa   : > { %p812_p6 = scmp.ge.s32.totalorder %s979_s29, 1  ;;  %p191_p7 = scmp.eq.s32.totalorder %s188_s12, 0 }
   0xb   : > { %p1085_p8 = por %p210_p5, %p209_p3  ;;  %p254_p9 = scmp.lt.s32.totalorder %s979_s29, 3 }
   0xc   : > { %s1091_s14 = scalar_select %p191_p7, %s967_s26, %s193_s10  }
   0xd   : > { %p255_p10 = pnand %p812_p6, %p254_p9 }
   0xe   : > { %s981_s19 = smov (!%p255_p10), 4   ;;  %s982_s30 = smov (!%p255_p10), 8  }
   0xf   : > { %258 = sbr.rel (%p255_p10) target bundleno = 498 (0x1f2), region = 48  ;;  %p286_p11 = scmp.lt.s32.totalorder (!%p255_p10), %s971_s27, 1 }
  0x10   : > { %s984_s22 = smov (!%p255_p10), 120   ;;  %s985_s15 = smov (!%p255_p10), 1  }
  0x11   : > { %s988_s18 = smov (!%p255_p10), 66   ;;  %s989_s20 = smov (!%p255_p10), 63  }
  0x12   : > { %s993_s23 = smov (!%p255_p10), 67   ;;  %s994_s8 = smov (!%p255_p10), 125  }
  0x13   : > { %s995_s10 = smov (!%p255_p10), 3   ;;  %s996_s12 = smov (!%p255_p10), 61  }
  0x14   : > { %v1096_v0 = vld [vmem:[%s1325_s5] sm:$0x7]  ;;  %v1108_v4 = vld [vmem:[%s1321_s1 + $0x4] sm:$0x7]  ;;  %v1115_v7 = vld [vmem:[%s1321_s1 + $0x8] sm:$0x7] }
  0x15   : > { %v1101_v1 = vld [vmem:[%s1321_s1] sm:$0x7]  ;;  %v329_v2 = vperm.slane %v1096_v0, 1  ;;  %v428_v5 = vperm.slane %v1108_v4, 2  ;;  %v476_v8 = vperm.slane %v1115_v7, 1  ;;  %v363_v9 = vperm.slane %v1096_v0, 2 }
  0x16   : > { %v312_v3 = vperm.slane %v1101_v1, 1  ;;  %v346_v6 = vperm.slane %v1101_v1, 2  ;;  %v394_v10 = vperm.slane %v1108_v4, 1  ;;  %v1125_v11 = vld [vmem:[%s1325_s5 + $0x4] sm:$0x7]  ;;  %v510_v14 = vperm.slane %v1115_v7, 2 }
  0x17   : > { %331 = vrot.lane.b32.xlu1 %v329_v2, %s981_s19  ;;  %478 = vrot.lane.b32.xlu2 %v476_v8, %s981_s19  ;;  %v445_v12 = vperm.slane %v1125_v11, 2  ;;  %v1133_v13 = vld [vmem:[%s1325_s5 + $0x8] sm:$0x7]  ;;  %v411_v16 = vperm.slane %v1125_v11, 1  ;;  %s287_s16 = scalar_select %p286_p11, %s971_s27, 1  ;;  %v307_v62 = vperm.slane %v1096_v0, 0 }
  0x18   : > { %314 = vrot.lane.b32.xlu0 %v312_v3, %s981_s19  ;;  %v527_v15 = vperm.slane %v1133_v13, 2  ;;  %v493_v17 = vperm.slane %v1133_v13, 1  ;;  %vm581_vm0 = vcmask 7168   ;;  %vm603_vm1 = vcmask 515072  }
  0x19   : > { %s825_s17 = smul.u32 24, %s287_s16  ;;  %s986_s16 = smov 65   ;;  %vm625_vm2 = vcmask 15360   ;;  %vm647_vm3 = vcmask 506880   ;;  %vm669_vm4 = vcmask 23552   ;;  %vm691_vm5 = vcmask 498688  }
  0x1a   : > { %vm706_vm6 = vcmask 523264  }
  0x1b   : > { %s1146_s21 = scalar_lea.vmem %s1320_s0, %s825_s17  ;;  %s987_s17 = smov 127  }
  0x1c   : > { %v1149_v18 = vld [vmem:[%s1146_s21] sm:$0xff]  ;;  %v1152_v19 = vld [vmem:[%s1146_s21 + $0x8] sm:$0xff] }
  0x1d   : > { %v1165_v29 = vld [vmem:[%s1146_s21 + $0x1] sm:$0xff]  ;;  %v1178_v39 = vld [vmem:[%s1146_s21 + $0x9] sm:$0xff]  ;;  %v308_v2 = vmul.f32 %v307_v62, %v1149_v18 }
  0x1e   : > { %v1181_v40 = vld [vmem:[%s1146_s21 + $0x2] sm:$0xff]  ;;  %v1190_v45 = vld [vmem:[%s1146_s21 + $0xa] sm:$0xff]  ;;  %s990_s21 = smov 2  }
  0x1f   : > { %430 = vrot.lane.b32.xlu1 %v428_v5, %s982_s30  ;;  %447 = vrot.lane.b32.xlu2 %v445_v12, %s982_s30  ;;  %v302_v12 = vperm.slane %v1101_v1, 0 }
  0x20   : > { %348 = vrot.lane.b32.xlu0 %v346_v6, %s982_s30 }
  0x27   : > { %365 = vrot.lane.b32.xlu1 %v363_v9, %s982_s30 }
  0x28   : > { %396 = vrot.lane.b32.xlu0 %v394_v10, %s981_s19 }
  0x2f   : > { %529 = vrot.lane.b32.xlu1 %v527_v15, %s982_s30 }
  0x30   : > { %512 = vrot.lane.b32.xlu0 %v510_v14, %s982_s30  ;;  %v309_v14 = vmul.f32 %v307_v62, %v1152_v19 }
  0x38   : > { %413 = vrot.lane.b32.xlu0 %v411_v16, %s981_s19  ;;  %v303_v16 = vmul.f32 %v302_v12, %v1149_v18 }
  0x40   : > { %495 = vrot.lane.b32.xlu0 %v493_v17, %s981_s19  ;;  %s983_s19 = smov 124   ;;  %v389_v17 = vperm.slane %v1125_v11, 0 }
  0x71   : > { %v479_v38 = vpop.permute.xlu2 %478 }
  0x72   : > { %v481_v41 = vmul.f32 %v1181_v40, %v479_v38  ;;  %v482_v52 = vmul.f32 %v1190_v45, %v479_v38 }
  0x79   : > { %v448_v53 = vpop.permute.xlu2 %447 }
  0x7a   : > { %v450_v54 = vmul.f32 %v1165_v29, %v448_v53  ;;  %v451_v55 = vmul.f32 %v1178_v39, %v448_v53 }
  0x89   : > { %v332_v20 = vpop.permute.xlu1 %331 }
  0x8a   : > { %v315_v21 = vpop.permute.xlu0 %314  ;;  %v334_v22 = vmul.f32 %v332_v20, %v1149_v18  ;;  %v335_v25 = vmul.f32 %v332_v20, %v1152_v19 }
  0x8b   : > { %v317_v23 = vmul.f32 %v315_v21, %v1149_v18  ;;  %v318_v24 = vmul.f32 %v315_v21, %v1152_v19  ;;  %v391_v21 = vmul.f32 %v1178_v39, %v389_v17 }
  0x8c   : > { %338 = vrot.lane.b32.xlu2 %v334_v22, %s983_s19 }
  0x8d   : > { %323 = vrot.lane.b32.xlu1 %v318_v24, %s983_s19  ;;  %321 = vrot.lane.b32.xlu0 %v317_v23, %s983_s19  ;;  %v384_v24 = vperm.slane %v1108_v4, 0 }
  0x91   : > { %v431_v26 = vpop.permute.xlu1 %430 }
  0x92   : > { %v349_v27 = vpop.permute.xlu0 %348  ;;  %v433_v37 = vmul.f32 %v1165_v29, %v431_v26  ;;  %v434_v46 = vmul.f32 %v1178_v39, %v431_v26 }
  0x93   : > { %v351_v28 = vmul.f32 %v349_v27, %v1149_v18  ;;  %v352_v32 = vmul.f32 %v349_v27, %v1152_v19  ;;  %v385_v27 = vmul.f32 %v1165_v29, %v384_v24 }
  0x94   : > { %340 = vrot.lane.b32.xlu2 %v335_v25, %s983_s19 }
  0x95   : > { %355 = vrot.lane.b32.xlu1 %v351_v28, %s984_s22 }
  0x99   : > { %v366_v30 = vpop.permute.xlu1 %365 }
  0x9a   : > { %v397_v31 = vpop.permute.xlu0 %396  ;;  %v369_v33 = vmul.f32 %v366_v30, %v1152_v19  ;;  %v368_v35 = vmul.f32 %v366_v30, %v1149_v18  ;;  %v466_v18 = vperm.slane %v1115_v7, 0  ;;  %v898_v7 = vld [vmem:[%s1322_s2] ss:$0 sm:$0xff] }
  0x9b   : > { %v399_v34 = vmul.f32 %v1165_v29, %v397_v31  ;;  %v400_v43 = vmul.f32 %v1178_v39, %v397_v31 }
  0x9c   : > { %357 = vrot.lane.b32.xlu2 %v352_v32, %s984_s22  ;;  %374 = vrot.lane.b32.xlu0 %v369_v33, %s984_s22  ;;  %v467_v4 = vmul.f32 %v1181_v40, %v466_v18  ;;  %v468_v62 = vmul.f32 %v1190_v45, %v466_v18 }
  0x9d   : > { %403 = vrot.lane.b32.xlu1 %v399_v34, %s983_s19  ;;  %v304_v34 = vmul.f32 %v302_v12, %v1152_v19  ;;  %v386_v19 = vmul.f32 %v1178_v39, %v384_v24 }
  0xa1   : > { %v530_v56 = vpop.permute.xlu1 %529 }
  0xa2   : > { %v513_v36 = vpop.permute.xlu0 %512  ;;  %v532_v58 = vmul.f32 %v1181_v40, %v530_v56  ;;  %v533_v59 = vmul.f32 %v1190_v45, %v530_v56 }
  0xa3   : > { %v516_v48 = vmul.f32 %v1190_v45, %v513_v36  ;;  %v515_v51 = vmul.f32 %v1181_v40, %v513_v36 }
  0xa4   : > { %372 = vrot.lane.b32.xlu2 %v368_v35, %s984_s22  ;;  %437 = vrot.lane.b32.xlu0 %v433_v37, %s984_s22  ;;  %v390_v35 = vmul.f32 %v1165_v29, %v389_v17 }
  0xaa   : > { %v414_v42 = vpop.permute.xlu0 %413 }
  0xab   : > { %v416_v44 = vmul.f32 %v1165_v29, %v414_v42  ;;  %v417_v47 = vmul.f32 %v1178_v39, %v414_v42  ;;  %v1234_v29 = vld [vmem:[%s1323_s3] sm:$0x7f] }
  0xac   : > { %405 = vrot.lane.b32.xlu2 %v400_v43, %s983_s19  ;;  %485 = vrot.lane.b32.xlu0 %v481_v41, %s983_s19  ;;  %v652_v18 = vperm.slane %v1234_v29, 6 }
  0xad   : > { %420 = vrot.lane.b32.xlu1 %v416_v44, %s983_s19 }
  0xb2   : > { %v496_v49 = vpop.permute.xlu0 %495 }
  0xb3   : > { %v499_v50 = vmul.f32 %v1190_v45, %v496_v49  ;;  %v498_v57 = vmul.f32 %v1181_v40, %v496_v49 }
  0xb4   : > { %422 = vrot.lane.b32.xlu2 %v417_v47, %s983_s19  ;;  %521 = vrot.lane.b32.xlu0 %v516_v48, %s984_s22 }
  0xb5   : > { %439 = vrot.lane.b32.xlu1 %v434_v46, %s984_s22 }
  0xbc   : > { %519 = vrot.lane.b32.xlu2 %v515_v51, %s984_s22  ;;  %504 = vrot.lane.b32.xlu0 %v499_v50, %s983_s19 }
  0xbd   : > { %487 = vrot.lane.b32.xlu1 %v482_v52, %s983_s19  ;;  %v564_v52 = vperm.slane %v1234_v29, 4 }
  0xc4   : > { %456 = vrot.lane.b32.xlu2 %v451_v55, %s984_s22 }
  0xc5   : > { %454 = vrot.lane.b32.xlu1 %v450_v54, %s984_s22  ;;  %v561_v54 = vperm.slane %v1234_v29, 3 }
  0xcc   : > { %502 = vrot.lane.b32.xlu2 %v498_v57, %s983_s19  ;;  %s991_s19 = smov 62  }
  0xcd   : > { %536 = vrot.lane.b32.xlu1 %v532_v58, %s984_s22  ;;  %v471_v58 = vperm.slane %v1133_v13, 0 }
  0xcf   : > { %v472_v17 = vmul.f32 %v1181_v40, %v471_v58 }
  0xd4   : > { %538 = vrot.lane.b32.xlu2 %v533_v59, %s984_s22  ;;  %s992_s22 = smov 126  }
  0xe6   : > { %v339_v60 = vpop.permute.xlu2 %338 }
  0xe7   : > { %v344_v3 = vadd.f32 %v339_v60, %v308_v2  ;;  %v473_v2 = vmul.f32 %v1190_v45, %v471_v58 }
  0xee   : > { %v341_v61 = vpop.permute.xlu2 %340 }
  0xef   : > { %v345_v20 = vadd.f32 %v341_v61, %v309_v14 }
  0xf6   : > { %v358_v63 = vpop.permute.xlu2 %357 }
  0xfe   : > { %v373_v5 = vpop.permute.xlu2 %372 }
  0xff   : > { %v378_v6 = vadd.f32 %v373_v5, %v344_v3  ;;  %v324_v8 = vpop.permute.xlu1 %323  ;;  %v322_v10 = vpop.permute.xlu0 %321 }
 0x100   : > { %v327_v23 = vadd.f32 %v322_v10, %v303_v16  ;;  %v328_v37 = vadd.f32 %v324_v8, %v304_v34  ;;  %v674_v34 = vperm.slane %v1234_v29, 0 }
 0x101   : > { %v392_v38 = vadd.f32 %v390_v35, %v378_v6 }
 0x102   : > { %v362_v49 = vadd.f32 %v358_v63, %v328_v37 }
 0x104   : > { %v388_v53 = vadd.f32 %v386_v19, %v362_v49 }
 0x106   : > { %v406_v9 = vpop.permute.xlu2 %405 }
 0x107   : > { %v356_v15 = vpop.permute.xlu1 %355  ;;  %v410_v59 = vadd.f32 %v406_v9, %v388_v53 }
 0x108   : > { %v361_v26 = vadd.f32 %v356_v15, %v327_v23 }
 0x10a   : > { %v387_v31 = vadd.f32 %v385_v27, %v361_v26  ;;  %v608_v26 = vperm.slane %v1234_v29, 5 }
 0x10e   : > { %v423_v0 = vpop.permute.xlu2 %422  ;;  %v375_v22 = vpop.permute.xlu0 %374 }
 0x10f   : > { %v379_v25 = vadd.f32 %v375_v22, %v345_v20  ;;  %v404_v30 = vpop.permute.xlu1 %403  ;;  %v586_v20 = vperm.slane %v1234_v29, 2 }
 0x110   : > { %v409_v33 = vadd.f32 %v404_v30, %v387_v31  ;;  %v630_v31 = vperm.slane %v1234_v29, 1 }
 0x111   : > { %v393_v1 = vadd.f32 %v391_v21, %v379_v25 }
 0x113   : > { %v427_v28 = vadd.f32 %v423_v0, %v393_v1 }
 0x116   : > { %v520_v32 = vpop.permute.xlu2 %519  ;;  %v438_v11 = vpop.permute.xlu0 %437 }
 0x117   : > { %v443_v36 = vadd.f32 %v438_v11, %v409_v33 }
 0x119   : > { %v469_v43 = vadd.f32 %v467_v4, %v443_v36 }
 0x11e   : > { %v457_v42 = vpop.permute.xlu2 %456  ;;  %v486_v47 = vpop.permute.xlu0 %485 }
 0x11f   : > { %v421_v41 = vpop.permute.xlu1 %420  ;;  %v461_v46 = vadd.f32 %v457_v42, %v427_v28  ;;  %v491_v48 = vadd.f32 %v486_v47, %v469_v43 }
 0x120   : > { %v426_v44 = vadd.f32 %v421_v41, %v392_v38 }
 0x121   : > { %v525_v50 = vadd.f32 %v520_v32, %v491_v48  ;;  %v475_v6 = vadd.f32 %v473_v2, %v461_v46 }
 0x123   : > { %v556_v51 = vadd.f32 %v898_v7, %v525_v50 }
 0x125   : > { %v1238_v55 = vmax.f32 %v556_v51, 0.0 }
 0x126   : > { %v503_v57 = vpop.permute.xlu2 %502  ;;  %v522_v39 = vpop.permute.xlu0 %521 }
 0x127   : > { %v440_v56 = vpop.permute.xlu1 %439  ;;  %v565_v60 = vmul.f32 %v564_v52, %v1238_v55  ;;  %v1244_v63 = vmul.f32 %v561_v54, %v1238_v55  ;;  %v587_v40 = vmul.f32 %v586_v20, %v1238_v55  ;;  %v609_v28 = vmul.f32 %v608_v26, %v1238_v55 }
 0x128   : > { %v444_v61 = vadd.f32 %v440_v56, %v410_v59  ;;  %v631_v32 = vmul.f32 %v630_v31, %v1238_v55  ;;  %v653_v35 = vmul.f32 %v652_v18, %v1238_v55  ;;  %v675_v36 = vmul.f32 %v674_v34, %v1238_v55 }
 0x129   : > { %575 = vrot.lane.b32.xlu2 %v565_v60, %s985_s15  ;;  %569 = vrot.lane.b32.xlu0 %v565_v60, %s986_s16 }
 0x12a   : > { %v470_v3 = vadd.f32 %v468_v62, %v444_v61 }
 0x12e   : > { %v505_v8 = vpop.permute.xlu0 %504  ;;  %v539_v9 = vpop.permute.xlu2 %538 }
 0x12f   : > { %v488_v5 = vpop.permute.xlu1 %487  ;;  %v509_v10 = vadd.f32 %v505_v8, %v475_v6 }
 0x130   : > { %v492_v13 = vadd.f32 %v488_v5, %v470_v3 }
 0x131   : > { %v1247_v14 = vadd.f32 %v539_v9, %v509_v10 }
 0x132   : > { %v526_v12 = vadd.f32 %v522_v39, %v492_v13  ;;  %v899_v13 = vld [vmem:[%s1326_s6] ss:$0 sm:$0xff] }
 0x134   : > { %v557_v15 = vadd.f32 %v898_v7, %v526_v12 }
 0x136   : > { %v559_v16 = vmax.f32 %v557_v15, 0.0 }
 0x137   : > { %v455_v0 = vpop.permute.xlu1 %454 }
 0x138   : > { %v460_v21 = vadd.f32 %v455_v0, %v426_v44  ;;  %v566_v22 = vmul.f32 %v564_v52, %v559_v16  ;;  %v588_v45 = vmul.f32 %v586_v20, %v559_v16  ;;  %v1251_v23 = vmul.f32 %v561_v54, %v559_v16 }
 0x139   : > { %v610_v30 = vmul.f32 %v608_v26, %v559_v16  ;;  %v632_v11 = vmul.f32 %v630_v31, %v559_v16  ;;  %v654_v33 = vmul.f32 %v652_v18, %v559_v16  ;;  %v676_v4 = vmul.f32 %v674_v34, %v559_v16 }
 0x13a   : > { %v474_v24 = vadd.f32 %v472_v17, %v460_v21  ;;  %571 = vrot.lane.b32.xlu1 %v566_v22, %s986_s16  ;;  %593 = vrot.lane.b32.xlu2 %v588_v45, %s987_s17  ;;  %v549_v21 = vadd.f32 %v899_v13, %v1247_v14 }
 0x13b   : > { %577 = vrot.lane.b32.xlu0 %v566_v22, %s985_s15 }
 0x13c   : > { %v508_v25 = vadd.f32 %v503_v57, %v474_v24  ;;  %v551_v26 = vmax.f32 %v549_v21, 0.0 }
 0x13f   : > { %v537_v27 = vpop.permute.xlu1 %536 }
 0x140   : > { %v1254_v1 = vadd.f32 %v537_v27, %v508_v25 }
 0x142   : > { %591 = vrot.lane.b32.xlu1 %v587_v40, %s987_s17  ;;  %613 = vrot.lane.b32.xlu2 %v609_v28, %s988_s18  ;;  %v548_v31 = vadd.f32 %v899_v13, %v1254_v1 }
 0x143   : > { %597 = vrot.lane.b32.xlu0 %v587_v40, %s989_s20 }
 0x14a   : > { %599 = vrot.lane.b32.xlu1 %v588_v45, %s989_s20  ;;  %621 = vrot.lane.b32.xlu2 %v610_v30, %s990_s21  ;;  %s283_s20 = sand.u32 1, %s963_s25  }
 0x14b   : > { %615 = vrot.lane.b32.xlu0 %v610_v30, %s988_s18  ;;  %s710_s15 = scalar_lea.sflag [#allocation3], %s283_s20 }
 0x152   : > { %619 = vrot.lane.b32.xlu1 %v609_v28, %s990_s21  ;;  %641 = vrot.lane.b32.xlu2 %v631_v32, %s991_s19  ;;  %s813_s21 = sshll.u32 %s283_s20, 4 }
 0x153   : > { %635 = vrot.lane.b32.xlu0 %v631_v32, %s992_s22 }
 0x15a   : > { %637 = vrot.lane.b32.xlu1 %v632_v11, %s992_s22  ;;  %659 = vrot.lane.b32.xlu2 %v654_v33, %s993_s23 }
 0x15b   : > { %643 = vrot.lane.b32.xlu0 %v632_v11, %s991_s19  ;;  %s824_s19 = sshll.u32 %s971_s27, 4  ;;  %v550_v11 = vmax.f32 %v548_v31, 0.0 }
 0x162   : > { %657 = vrot.lane.b32.xlu1 %v653_v35, %s993_s23  ;;  %679 = vrot.lane.b32.xlu2 %v675_v36, %s994_s8 }
 0x163   : > { %663 = vrot.lane.b32.xlu0 %v653_v35, %s995_s10 }
 0x16a   : > { %665 = vrot.lane.b32.xlu1 %v654_v33, %s995_s10  ;;  %687 = vrot.lane.b32.xlu2 %v676_v4, %s996_s12  ;;  %s285_s10 = scalar_lea.vmem [#allocation2], %s813_s21 }
 0x16b   : > { %681 = vrot.lane.b32.xlu0 %v676_v4, %s994_s8  ;;  %s723_s8 = scalar_lea.hbm %s1327_s7, %s824_s19  ;;  %s724_s27 = sshll.u32 %s285_s10, 4  ;;  %s725_s27 = int_to_ptr.vmem [resolvable:$true] %s724_s27 }
 0x16c   : > { %s921_s19 = scalar_lea.hbm %s1327_s7, 32 }
 0x172   : > { %685 = vrot.lane.b32.xlu1 %v675_v36, %s996_s12  ;;  %s726_s12 = sshll.u32 %s723_s8, 4  ;;  %s727_s12 = int_to_ptr.hbm [resolvable:$true] %s726_s12 }
 0x173   : > { %s915_s16 = sshra.s32 %s727_s12, 4  ;;  %s916_s16 = int_to_ptr.hbm [resolvable:$true] %s915_s16 }
 0x174   : > { %s917_s17 = scalar_lea.hbm %s916_s16, 16  ;;  %p922_p1 = scmp.lt.s32.totalorder %s916_s16, %s1327_s7 }
 0x175   : > { %p918_p12 = scmp.ne.s32.totalorder %s916_s16, %s917_s17  ;;  %p923_p2 = scmp.lt.s32.totalorder %s921_s19, %s917_s17 }
 0x177   : > { %p919_p13 = pnand %p918_p12, %p1078_p4  ;;  %p924_p3 = por %p923_p2, %p922_p1 }
 0x179   : > { %p920_p0 = pneg %p919_p13 }
 0x17b   : > { %p925_p5 = pnand %p924_p3, %p920_p0 }
 0x183   : > { %v576_v37 = vpop.permute.xlu2 %575 }
 0x194   : > { %v594_v38 = vpop.permute.xlu2 %593 }
 0x19b   : > { %v570_v41 = vpop.permute.xlu0 %569 }
 0x19c   : > { %v614_v42 = vpop.permute.xlu2 %613  ;;  %v582_v60 = vsel %vm581_vm0, %v570_v41, %v576_v37 }
 0x19d   : > { %v584_v3 = vadd.f32 %v582_v60, %v1244_v63  ;;  %v900_v63 = vld [vmem:[%s1324_s4] ss:$0 sm:$0xff] }
 0x1a4   : > { %v622_v7 = vpop.permute.xlu2 %621 }
 0x1ac   : > { %v572_v43 = vpop.permute.xlu1 %571  ;;  %v642_v19 = vpop.permute.xlu2 %641 }
 0x1ad   : > { %v578_v44 = vpop.permute.xlu0 %577 }
 0x1ae   : > { %v583_v54 = vsel %vm581_vm0, %v572_v43, %v578_v44 }
 0x1af   : > { %v585_v56 = vadd.f32 %v583_v54, %v1251_v23 }
 0x1b4   : > { %v592_v46 = vpop.permute.xlu1 %591  ;;  %v660_v51 = vpop.permute.xlu2 %659 }
 0x1b5   : > { %v598_v47 = vpop.permute.xlu0 %597 }
 0x1b6   : > { %v604_v61 = vsel %vm603_vm1, %v592_v46, %v598_v47 }
 0x1b7   : > { %v606_v8 = vadd.f32 %v604_v61, %v584_v3 }
 0x1bc   : > { %v600_v48 = vpop.permute.xlu1 %599  ;;  %v680_v57 = vpop.permute.xlu2 %679 }
 0x1bd   : > { %v616_v49 = vpop.permute.xlu0 %615  ;;  %v605_v55 = vsel %vm603_vm1, %v594_v38, %v600_v48 }
 0x1be   : > { %v607_v39 = vadd.f32 %v605_v55, %v585_v56  ;;  %v627_v62 = vsel %vm625_vm2, %v616_v49, %v622_v7 }
 0x1c0   : > { %v629_v5 = vadd.f32 %v627_v62, %v607_v39 }
 0x1c4   : > { %v620_v29 = vpop.permute.xlu1 %619  ;;  %v688_v17 = vpop.permute.xlu2 %687 }
 0x1c5   : > { %v636_v50 = vpop.permute.xlu0 %635  ;;  %v626_v6 = vsel %vm625_vm2, %v614_v42, %v620_v29 }
 0x1c6   : > { %v628_v16 = vadd.f32 %v626_v6, %v606_v8  ;;  %v648_v45 = vsel %vm647_vm3, %v636_v50, %v642_v19 }
 0x1c8   : > { %v650_v24 = vadd.f32 %v648_v45, %v628_v16 }
 0x1cc   : > { %v638_v52 = vpop.permute.xlu1 %637 }
 0x1cd   : > { %v644_v53 = vpop.permute.xlu0 %643 }
 0x1ce   : > { %v649_v2 = vsel %vm647_vm3, %v638_v52, %v644_v53 }
 0x1cf   : > { %v651_v9 = vadd.f32 %v649_v2, %v629_v5 }
 0x1d4   : > { %v658_v58 = vpop.permute.xlu1 %657 }
 0x1d5   : > { %v664_v59 = vpop.permute.xlu0 %663 }
 0x1d6   : > { %v670_v23 = vsel %vm669_vm4, %v658_v58, %v664_v59 }
 0x1d7   : > { %v672_v27 = vadd.f32 %v670_v23, %v650_v24 }
 0x1dc   : > { %v666_v10 = vpop.permute.xlu1 %665 }
 0x1dd   : > { %v671_v12 = vsel %vm669_vm4, %v660_v51, %v666_v10  ;;  %v682_v15 = vpop.permute.xlu0 %681 }
 0x1de   : > { %v673_v20 = vadd.f32 %v671_v12, %v651_v9  ;;  %v693_v0 = vsel %vm691_vm5, %v682_v15, %v688_v17 }
 0x1e0   : > { %v695_v22 = vadd.f32 %v693_v0, %v673_v20 }
 0x1e2   : > { %v701_v25 = vadd.f32 %v900_v63, %v695_v22 }
 0x1e4   : > { %v703_v40 = vmax.f32 %v701_v25, 0.0  ;;  %v686_v28 = vpop.permute.xlu1 %685 }
 0x1e5   : > { %v692_v30 = vsel %vm691_vm5, %v680_v57, %v686_v28 }
 0x1e6   : > { %v705_v14 = vadd.f32 %v703_v40, %v551_v26  ;;  %v694_v32 = vadd.f32 %v692_v30, %v672_v27 }
 0x1e8   : > { %v700_v18 = vadd.f32 %v900_v63, %v694_v32  ;;  %708 = vst.msk [vmem:[%s285_s10 + $0x8] sm:$0xff] %vm706_vm6, %v705_v14 }
 0x1ea   : > { %v702_v33 = vmax.f32 %v700_v18, 0.0 }
 0x1ec   : > { %v704_v34 = vadd.f32 %v702_v33, %v550_v11 }
 0x1ee   : > { %707 = vst.msk [vmem:[%s285_s10] sm:$0xff] %vm706_vm6, %v704_v34 }
 0x1ef   : > { %928 = shalt.err (!%p925_p5)
}
 0x1f0   : > { %s997_s20 = smov 128  }
 0x1f1   : > { %826 = dma.vmem_to_hbm [thread:$0]  (%p1078_p4), %s725_s27, 256, %s727_s12, %s710_s15, %s997_s20, %s997_s20, %s982_s30  }
 0x1f2 PF: > { %p832_p6 = scmp.ge.s32.totalorder %s979_s29, 2  ;;  %s741_s8 = sand.u32 1, %s959_s24  }
 0x1f3   : > { %s742_s10 = scalar_lea.sflag [#allocation3], %s741_s8 }
 0x1f4   : > { %p829_p7 = pnand %p832_p6, %p1085_p8 }
 0x1f6   : > { %p830_p9 = pneg %p829_p7 }
 0x1f8   : > { %954 = dma.done.wait (%p830_p9), %s742_s10, 256  }
 0x1f9   : > { %956 = vsyncadd (%p830_p9), %s742_s10, 4294967040  ;;  %s20_s29 = sadd.s32 1, %s979_s29   ;;  %s1330_s24 = smov %s963_s25 }
 0x1fa   : > { %p17_p10 = scmp.ge.s32.totalorder %s20_s29, 4   ;;  %s1331_s25 = smov %s967_s26 }
 0x1fb   : > { %s1332_s26 = smov %s1091_s14  ;;  %s1333_s27 = smov %s975_s28 }
 0x1fc   : > { %s1334_s28 = smov %s1336_s9  ;;  %19 = sbr.rel (!%p17_p10) target bundleno = 4 (0x4), region = 86 }
 0x201   :  { %748 = vsyncpa [#allocation3], 1 }
 0x202   :  { %750 = vsyncpa [#allocation3 + $0x1], 1 }

</bundles_post_ra>
